<compile_context>
chip_gen: v6e
topology: v6e:2x2x1
jax: 0.10.0
libtpu: 0.0.40
codegen_flags: <defaults>
</compile_context>

<pallas_src>
import jax
import jax.numpy as jnp
from jax.experimental import pallas as pl
from jax.experimental.pallas import tpu as pltpu

BF16_EPS = 0.0078125  # torch.finfo(torch.bfloat16).eps
_NEG = -1e30


def _round_up(x, m):
    return (x + m - 1) // m * m


def _pick_row_tile(n, hp, vp, vmem_budget=48 * 1024 * 1024):
    """Pick a row tile so the per-step working set stays under ~48 MiB."""
    # rough per-row f32 bytes: 2 emb tiles (double-buffered) + logits out
    # (double-buffered) + ~4 live (TN, Vp) intermediates (s/t logits, exp, kl).
    per_row = 2 * 2 * hp * 4 + 2 * vp * 4 + 4 * vp * 4
    tn = min(512, max(8, vmem_budget // max(per_row, 1)))
    tn = (tn // 8) * 8
    if n <= tn:
        return _round_up(n, 8)
    return tn


# ---------------------------------------------------------------------------
# Fused kernel: student+teacher LM forward + CE + KL + layerwise reductions
# ---------------------------------------------------------------------------
def _make_fused_kernel(v_true, n_true, temperature):
    inv_t = 1.0 / float(temperature)

    def kernel(s_emb_ref, t_emb_ref, tgt_ref,
               s_w1_ref, s_b1_ref, s_w2_ref, s_b2_ref,
               t_w1_ref, t_b1_ref, t_w2_ref, t_b2_ref,
               logits_ref, part_ref):
        i = pl.program_id(0)
        tn, hp = s_emb_ref.shape
        vp = logits_ref.shape[1]

        s_emb = s_emb_ref[...]            # f32 (TN, Hp) — kept f32 for layerwise
        t_emb = t_emb_ref[...]

        def lm(emb_f32, w1, b1, w2, b2):
            # bf16 MXU inputs, f32 accumulation; elementwise math in f32.
            h = jnp.tanh(
                jnp.dot(emb_f32.astype(jnp.bfloat16), w1[...],
                        preferred_element_type=jnp.float32) + b1[...])
            lg = jnp.dot(h.astype(jnp.bfloat16), w2[...],
                         preferred_element_type=jnp.float32) + b2[...]
            return h, lg

        s_h, s_lg = lm(s_emb, s_w1_ref, s_b1_ref, s_w2_ref, s_b2_ref)
        t_h, t_lg = lm(t_emb, t_w1_ref, t_b1_ref, t_w2_ref, t_b2_ref)

        logits_ref[...] = s_lg            # lane-dense (TN, Vp) f32 store

        lane = jax.lax.broadcasted_iota(jnp.int32, (tn, vp), 1)
        valid_lane = lane < v_true
        row_ids = i * tn + jax.lax.broadcasted_iota(jnp.int32, (tn, 1), 0)
        valid_row = row_ids < n_true
        row_f = valid_row.astype(jnp.float32)          # (TN, 1)

        s_m = jnp.where(valid_lane, s_lg, _NEG)
        t_m = jnp.where(valid_lane, t_lg, _NEG)

        # --- cross-entropy (student task loss), ignore_index = -100 ---
        tgt = tgt_ref[...]                               # (TN, 1) int32
        ms = jnp.max(s_m, axis=-1, keepdims=True)
        lse = jnp.log(jnp.sum(jnp.exp(s_m - ms), axis=-1, keepdims=True)) + ms
        tgt_logit = jnp.sum(jnp.where(lane == tgt, s_m, 0.0),
                            axis=-1, keepdims=True)
        ce_valid = jnp.logical_and(valid_row, tgt != -100).astype(jnp.float32)
        ce_sum = jnp.sum((lse - tgt_logit) * ce_valid)
        ce_cnt = jnp.sum(ce_valid)

        # --- KL(teacher || student) at temperature (reuses teacher exp) ---
        ss = s_m * inv_t
        tt = t_m * inv_t
        mss = jnp.max(ss, axis=-1, keepdims=True)
        zs = ss - mss
        ses = jnp.sum(jnp.exp(zs), axis=-1, keepdims=True)
        lps = zs - jnp.log(ses)
        mtt = jnp.max(tt, axis=-1, keepdims=True)
        zt = tt - mtt
        et = jnp.exp(zt)
        set_ = jnp.sum(et, axis=-1, keepdims=True)
        lpt = zt - jnp.log(set_)
        # softmax(t/T) reuses et; reciprocal goes to the EUP slot (free-ish).
        pt = et * pl.reciprocal(set_, approx=True)
        kl = jnp.where(valid_lane, pt * (lpt - lps), 0.0)
        kl_sum = jnp.sum(kl * row_f)

        # --- layerwise reductions: embedding layer + hidden layer ---
        de = s_emb - t_emb
        diff_emb = jnp.sum(de * de * row_f)
        tsq_emb = jnp.sum(t_emb * t_emb * row_f)
        dh = s_h - t_h
        diff_hid = jnp.sum(dh * dh * row_f)
        tsq_hid = jnp.sum(t_h * t_h * row_f)

        # pack the 7 partial scalars into a lane-dense (8,128) block
        plane = jax.lax.broadcasted_iota(jnp.int32, (8, 128), 1)
        prow0 = jax.lax.broadcasted_iota(jnp.int32, (8, 128), 0) == 0
        acc = jnp.zeros((8, 128), jnp.float32)
        for k, val in enumerate((ce_sum, ce_cnt, kl_sum,
                                 diff_emb, tsq_emb, diff_hid, tsq_hid)):
            acc = acc + jnp.where(jnp.logical_and(prow0, plane == k), val, 0.0)
        part_ref[...] = acc

    return kernel


def _fused_distill_call(s_emb, t_emb, tgt, s_w, t_w, *, v_true, n_true,
                        tn, temperature):
    np_, hp = s_emb.shape
    vp = s_w["w2"].shape[1]
    grid = np_ // tn

    kernel = _make_fused_kernel(v_true, n_true, temperature)

    row_spec = pl.BlockSpec((tn, hp), lambda i: (i, 0))
    tgt_spec = pl.BlockSpec((tn, 1), lambda i: (i, 0))

    def full(arr):
        return pl.BlockSpec(arr.shape, lambda i: (0, 0))

    grid_spec = pltpu.PrefetchScalarGridSpec(
        num_scalar_prefetch=0,
        grid=(grid,),
        in_specs=[row_spec, row_spec, tgt_spec,
                  full(s_w["w1"]), full(s_w["b1"]),
                  full(s_w["w2"]), full(s_w["b2"]),
                  full(t_w["w1"]), full(t_w["b1"]),
                  full(t_w["w2"]), full(t_w["b2"])],
        out_specs=(pl.BlockSpec((tn, vp), lambda i: (i, 0)),
                   pl.BlockSpec((8, 128), lambda i: (i, 0))),
    )

    logits, partials = pl.pallas_call(
        kernel,
        out_shape=(jax.ShapeDtypeStruct((np_, vp), jnp.float32),
                   jax.ShapeDtypeStruct((grid * 8, 128), jnp.float32)),
        grid_spec=grid_spec,
        compiler_params=pltpu.CompilerParams(
            dimension_semantics=("parallel",),
            vmem_limit_bytes=48 * 1024 * 1024,
        ),
    )(s_emb, t_emb, tgt,
      s_w["w1"], s_w["b1"], s_w["w2"], s_w["b2"],
      t_w["w1"], t_w["b1"], t_w["w2"], t_w["b2"])
    return logits, partials


# ---------------------------------------------------------------------------
# Parameter / input preparation (plain JAX glue)
# ---------------------------------------------------------------------------
def init_tiny_lm(key, vocab, hidden):
    k0, k1, k2 = jax.random.split(key, 3)
    return {
        "wte": 0.02 * jax.random.normal(k0, (vocab, hidden), jnp.float32),
        "w1": 0.02 * jax.random.normal(k1, (hidden, hidden), jnp.float32),
        "b1": jnp.zeros((1, hidden), jnp.float32),
        "w2": 0.02 * jax.random.normal(k2, (hidden, vocab), jnp.float32),
        "b2": jnp.zeros((1, vocab), jnp.float32),
    }


def _pad_params(p, hp, vp):
    h = p["w1"].shape[0]
    v = p["w2"].shape[1]
    return {
        "w1": jnp.pad(p["w1"], ((0, hp - h), (0, hp - h))).astype(jnp.bfloat16),
        "b1": jnp.pad(p["b1"], ((0, 0), (0, hp - h))).astype(jnp.float32),
        "w2": jnp.pad(p["w2"], ((0, hp - h), (0, vp - v))).astype(jnp.bfloat16),
        "b2": jnp.pad(p["b2"], ((0, 0), (0, vp - v))).astype(jnp.float32),
    }


def _embed(wte, idx, hp):
    emb = jnp.take(wte, idx, axis=0)                 # (B,T,H) — glue gather
    b, t, h = emb.shape
    e2 = emb.reshape(b * t, h).astype(jnp.float32)
    if hp > h:
        e2 = jnp.pad(e2, ((0, 0), (0, hp - h)))
    return e2


def distill_model_forward(student_params, teacher_params, idx, targets=None,
                          output_hidden_state=True, temperature=2.0):
    """Mirrors Distill_Model.forward (student+teacher LMs are tiny tanh-MLPs)."""
    b, t = idx.shape
    n = b * t
    h = student_params["w1"].shape[0]
    v = student_params["w2"].shape[1]
    hp = _round_up(max(h, 128), 128)
    vp = _round_up(max(v, 128), 128)

    tn = _pick_row_tile(n, hp, vp)
    np_ = _round_up(n, tn)
    pad_rows = np_ - n

    s_emb = _embed(student_params["wte"], idx, hp)
    t_emb = jax.lax.stop_gradient(_embed(teacher_params["wte"], idx, hp))
    if pad_rows:
        s_emb = jnp.pad(s_emb, ((0, pad_rows), (0, 0)))
        t_emb = jnp.pad(t_emb, ((0, pad_rows), (0, 0)))

    if targets is not None:
        tgt = targets.reshape(-1).astype(jnp.int32)
    else:
        tgt = jnp.full((n,), -100, jnp.int32)
    tgt = jnp.pad(tgt, (0, pad_rows), constant_values=-100).reshape(np_, 1)

    s_w = _pad_params(student_params, hp, vp)
    t_w = jax.tree_util.tree_map(jax.lax.stop_gradient,
                                 _pad_params(teacher_params, hp, vp))

    logits_pad, partials = _fused_distill_call(
        s_emb, t_emb, tgt, s_w, t_w,
        v_true=v, n_true=n, tn=tn, temperature=temperature)

    p = jnp.sum(partials, axis=0)                    # (128,)
    ce_sum, ce_cnt, kl_sum = p[0], p[1], p[2]
    diff_emb, tsq_emb, diff_hid, tsq_hid = p[3], p[4], p[5], p[6]

    student_logits = logits_pad[:n, :v].reshape(b, t, v)
    task_loss = None if targets is None else ce_sum / jnp.maximum(ce_cnt, 1.0)
    kl_loss = kl_sum * (temperature ** 2) / n
    if output_hidden_state:
        numel = float(n * h)
        layerwise_loss = ((diff_emb / numel) / (tsq_emb / numel + BF16_EPS)
                          + (diff_hid / numel) / (tsq_hid / numel + BF16_EPS))
    else:
        layerwise_loss = None
    return student_logits, task_loss, layerwise_loss, kl_loss


# ---------------------------------------------------------------------------
# Pure-JAX reference (same bf16-matmul recipe) for a sanity check
# ---------------------------------------------------------------------------
def _reference_forward(sp, tp, idx, targets, temperature):
    def lm(p):
        emb = jnp.take(p["wte"], idx, axis=0).astype(jnp.float32)
        b, t, h = emb.shape
        e2 = emb.reshape(b * t, h)
        hdn = jnp.tanh(jnp.dot(e2.astype(jnp.bfloat16),
                               p["w1"].astype(jnp.bfloat16),
                               preferred_element_type=jnp.float32) + p["b1"])
        lg = jnp.dot(hdn.astype(jnp.bfloat16), p["w2"].astype(jnp.bfloat16),
                     preferred_element_type=jnp.float32) + p["b2"]
        return e2, hdn, lg

    se, sh, sl = lm(sp)
    te, th, tl = lm(tp)
    n = sl.shape[0]

    def log_softmax(x):
        m = jnp.max(x, axis=-1, keepdims=True)
        z = x - m
        return z - jnp.log(jnp.sum(jnp.exp(z), axis=-1, keepdims=True))

    ce = -jnp.mean(jnp.take_along_axis(log_softmax(sl),
                                       targets.reshape(n, 1), axis=1))
    lps = log_softmax(sl / temperature)
    lpt = log_softmax(tl / temperature)
    kl = jnp.sum(jnp.exp(lpt) * (lpt - lps)) * (temperature ** 2) / n
    lw = (jnp.mean((se - te) ** 2) / (jnp.mean(te ** 2) + BF16_EPS)
          + jnp.mean((sh - th) ** 2) / (jnp.mean(th ** 2) + BF16_EPS))
    return sl, ce, lw, kl


if __name__ == "__main__":
    B, T, H, V = 2, 8, 32, 64

    key = jax.random.PRNGKey(0)
    k_idx, k_tgt, k_stu, k_tea = jax.random.split(key, 4)

    idx = jax.random.randint(k_idx, (B, T), 0, V, dtype=jnp.int32)
    targets = jax.random.randint(k_tgt, (B, T), 0, V, dtype=jnp.int32)

    student_params = init_tiny_lm(k_stu, V, H)
    teacher_params = init_tiny_lm(k_tea, V, H)

    s_logits, task_loss, lw_loss, kl = distill_model_forward(
        student_params, teacher_params, idx, targets,
        output_hidden_state=True, temperature=2.0,
    )
    jax.block_until_ready((s_logits, task_loss, lw_loss, kl))

    assert s_logits.shape == (B, T, V)
    assert task_loss.shape == () and lw_loss.shape == () and kl.shape == ()
    assert bool(jnp.all(jnp.isfinite(s_logits)))
    assert bool(jnp.isfinite(task_loss)) and bool(jnp.isfinite(lw_loss))
    assert bool(jnp.isfinite(kl))

    # loose sanity check against a pure-JAX reference using the same bf16 recipe
    rl, rce, rlw, rkl = _reference_forward(
        student_params, teacher_params, idx, targets, 2.0)
    assert bool(jnp.allclose(s_logits.reshape(-1, V), rl, atol=1e-4))
    assert bool(jnp.allclose(task_loss, rce, rtol=1e-3, atol=1e-3))
    assert bool(jnp.allclose(lw_loss, rlw, rtol=1e-2, atol=1e-3))
    assert bool(jnp.allclose(kl, rkl, rtol=1e-2, atol=1e-5))

    # also exercise the output_hidden_state=False path
    s2, t2, l2, k2 = distill_model_forward(
        student_params, teacher_params, idx, targets,
        output_hidden_state=False, temperature=2.0)
    jax.block_until_ready((s2, t2, k2))
    assert l2 is None

    print("KERNEL_OK")
</pallas_src>

<mosaic_0001>
module attributes {stable_mosaic.version = 11 : i64} {
  func.func @kernel(%arg0: i32, %arg1: memref<16x128xf32, #tpu.memory_space<vmem>>, %arg2: memref<16x128xf32, #tpu.memory_space<vmem>>, %arg3: memref<16x1xi32, #tpu.memory_space<vmem>>, %arg4: memref<128x128xbf16, #tpu.memory_space<vmem>>, %arg5: memref<1x128xf32, #tpu.memory_space<vmem>>, %arg6: memref<128x128xbf16, #tpu.memory_space<vmem>>, %arg7: memref<1x128xf32, #tpu.memory_space<vmem>>, %arg8: memref<128x128xbf16, #tpu.memory_space<vmem>>, %arg9: memref<1x128xf32, #tpu.memory_space<vmem>>, %arg10: memref<128x128xbf16, #tpu.memory_space<vmem>>, %arg11: memref<1x128xf32, #tpu.memory_space<vmem>>, %arg12: memref<16x128xf32, #tpu.memory_space<vmem>>, %arg13: memref<8x128xf32, #tpu.memory_space<vmem>>) attributes {dimension_semantics = [#tpu.dimension_semantics<parallel>], iteration_bounds = array<i64: 1>, scalar_prefetch = 0 : i64, scratch_operands = 0 : i64, tpu.core_type = #tpu.core_type<tc>, window_params = [{transform_indices = @transform_0, window_bounds = array<i64: 16, 128>}, {transform_indices = @transform_1, window_bounds = array<i64: 16, 128>}, {transform_indices = @transform_2, window_bounds = array<i64: 16, 1>}, {pipeline_mode = #tpu.pipeline_mode<synchronous>, transform_indices = @transform_3, window_bounds = array<i64: 128, 128>}, {pipeline_mode = #tpu.pipeline_mode<synchronous>, transform_indices = @transform_4, window_bounds = array<i64: 1, 128>}, {pipeline_mode = #tpu.pipeline_mode<synchronous>, transform_indices = @transform_5, window_bounds = array<i64: 128, 128>}, {pipeline_mode = #tpu.pipeline_mode<synchronous>, transform_indices = @transform_6, window_bounds = array<i64: 1, 128>}, {pipeline_mode = #tpu.pipeline_mode<synchronous>, transform_indices = @transform_7, window_bounds = array<i64: 128, 128>}, {pipeline_mode = #tpu.pipeline_mode<synchronous>, transform_indices = @transform_8, window_bounds = array<i64: 1, 128>}, {pipeline_mode = #tpu.pipeline_mode<synchronous>, transform_indices = @transform_9, window_bounds = array<i64: 128, 128>}, {pipeline_mode = #tpu.pipeline_mode<synchronous>, transform_indices = @transform_10, window_bounds = array<i64: 1, 128>}, {transform_indices = @transform_11, window_bounds = array<i64: 16, 128>}, {transform_indices = @transform_12, window_bounds = array<i64: 8, 128>}]} {
    %c0 = arith.constant 0 : index
    %c0_0 = arith.constant 0 : index
    %0 = vector.load %arg1[%c0, %c0_0] : memref<16x128xf32, #tpu.memory_space<vmem>>, vector<16x128xf32>
    %c0_1 = arith.constant 0 : index
    %c0_2 = arith.constant 0 : index
    %1 = vector.load %arg2[%c0_1, %c0_2] : memref<16x128xf32, #tpu.memory_space<vmem>>, vector<16x128xf32>
    %2 = arith.truncf %0 : vector<16x128xf32> to vector<16x128xbf16>
    %c0_3 = arith.constant 0 : index
    %c0_4 = arith.constant 0 : index
    %3 = vector.load %arg4[%c0_3, %c0_4] : memref<128x128xbf16, #tpu.memory_space<vmem>>, vector<128x128xbf16>
    %cst = arith.constant dense<0.000000e+00> : vector<16x128xf32>
    %4 = tpu.matmul %2, %3, %cst {dimension_numbers = #tpu.dot_dimension_numbers<[1], [0], [0], [1], [0, 0, 1, 1], [], []>} : vector<16x128xbf16>, vector<128x128xbf16>, vector<16x128xf32> -> vector<16x128xf32>
    %c0_5 = arith.constant 0 : index
    %c0_6 = arith.constant 0 : index
    %5 = vector.load %arg5[%c0_5, %c0_6] : memref<1x128xf32, #tpu.memory_space<vmem>>, vector<1x128xf32>
    %6 = vector.broadcast %5 : vector<1x128xf32> to vector<16x128xf32>
    %7 = arith.addf %4, %6 : vector<16x128xf32>
    %8 = math.tanh %7 : vector<16x128xf32>
    %9 = arith.truncf %8 : vector<16x128xf32> to vector<16x128xbf16>
    %c0_7 = arith.constant 0 : index
    %c0_8 = arith.constant 0 : index
    %10 = vector.load %arg6[%c0_7, %c0_8] : memref<128x128xbf16, #tpu.memory_space<vmem>>, vector<128x128xbf16>
    %cst_9 = arith.constant dense<0.000000e+00> : vector<16x128xf32>
    %11 = tpu.matmul %9, %10, %cst_9 {dimension_numbers = #tpu.dot_dimension_numbers<[1], [0], [0], [1], [0, 0, 1, 1], [], []>} : vector<16x128xbf16>, vector<128x128xbf16>, vector<16x128xf32> -> vector<16x128xf32>
    %c0_10 = arith.constant 0 : index
    %c0_11 = arith.constant 0 : index
    %12 = vector.load %arg7[%c0_10, %c0_11] : memref<1x128xf32, #tpu.memory_space<vmem>>, vector<1x128xf32>
    %13 = vector.broadcast %12 : vector<1x128xf32> to vector<16x128xf32>
    %14 = arith.addf %11, %13 : vector<16x128xf32>
    %15 = arith.truncf %1 : vector<16x128xf32> to vector<16x128xbf16>
    %c0_12 = arith.constant 0 : index
    %c0_13 = arith.constant 0 : index
    %16 = vector.load %arg8[%c0_12, %c0_13] : memref<128x128xbf16, #tpu.memory_space<vmem>>, vector<128x128xbf16>
    %cst_14 = arith.constant dense<0.000000e+00> : vector<16x128xf32>
    %17 = tpu.matmul %15, %16, %cst_14 {dimension_numbers = #tpu.dot_dimension_numbers<[1], [0], [0], [1], [0, 0, 1, 1], [], []>} : vector<16x128xbf16>, vector<128x128xbf16>, vector<16x128xf32> -> vector<16x128xf32>
    %c0_15 = arith.constant 0 : index
    %c0_16 = arith.constant 0 : index
    %18 = vector.load %arg9[%c0_15, %c0_16] : memref<1x128xf32, #tpu.memory_space<vmem>>, vector<1x128xf32>
    %19 = vector.broadcast %18 : vector<1x128xf32> to vector<16x128xf32>
    %20 = arith.addf %17, %19 : vector<16x128xf32>
    %21 = math.tanh %20 : vector<16x128xf32>
    %22 = arith.truncf %21 : vector<16x128xf32> to vector<16x128xbf16>
    %c0_17 = arith.constant 0 : index
    %c0_18 = arith.constant 0 : index
    %23 = vector.load %arg10[%c0_17, %c0_18] : memref<128x128xbf16, #tpu.memory_space<vmem>>, vector<128x128xbf16>
    %cst_19 = arith.constant dense<0.000000e+00> : vector<16x128xf32>
    %24 = tpu.matmul %22, %23, %cst_19 {dimension_numbers = #tpu.dot_dimension_numbers<[1], [0], [0], [1], [0, 0, 1, 1], [], []>} : vector<16x128xbf16>, vector<128x128xbf16>, vector<16x128xf32> -> vector<16x128xf32>
    %c0_20 = arith.constant 0 : index
    %c0_21 = arith.constant 0 : index
    %25 = vector.load %arg11[%c0_20, %c0_21] : memref<1x128xf32, #tpu.memory_space<vmem>>, vector<1x128xf32>
    %26 = vector.broadcast %25 : vector<1x128xf32> to vector<16x128xf32>
    %27 = arith.addf %24, %26 : vector<16x128xf32>
    %c0_22 = arith.constant 0 : index
    %c0_23 = arith.constant 0 : index
    %28 = vector.load %arg12[%c0_22, %c0_23] : memref<16x128xf32, #tpu.memory_space<vmem>>, vector<16x128xf32>
    tpu.vector_store %arg12[%c0_22, %c0_23], %14 {strides = array<i32>} : memref<16x128xf32, #tpu.memory_space<vmem>>, vector<16x128xf32>,
    %29 = tpu.iota {dimensions = array<i32: 1>} : vector<16x128xi32>
    %c64_i32 = arith.constant 64 : i32
    %30 = vector.broadcast %c64_i32 : i32 to vector<16x128xi32>
    %31 = arith.cmpi slt, %29, %30 : vector<16x128xi32>
    %c16_i32 = arith.constant 16 : i32
    %32 = arith.muli %arg0, %c16_i32 : i32
    %33 = tpu.iota {dimensions = array<i32: 0>} : vector<16x1xi32>
    %34 = vector.broadcast %32 : i32 to vector<16x1xi32>
    %35 = arith.addi %34, %33 : vector<16x1xi32>
    %c16_i32_24 = arith.constant 16 : i32
    %36 = vector.broadcast %c16_i32_24 : i32 to vector<16x1xi32>
    %37 = arith.cmpi slt, %35, %36 : vector<16x1xi32>
    %38 = arith.extui %37 : vector<16x1xi1> to vector<16x1xi32>
    %39 = arith.sitofp %38 : vector<16x1xi32> to vector<16x1xf32>
    %cst_25 = arith.constant -1.000000e+30 : f32
    %40 = vector.broadcast %cst_25 : f32 to vector<16x128xf32>
    %41 = arith.select %31, %14, %40 : vector<16x128xi1>, vector<16x128xf32>
    %cst_26 = arith.constant -1.000000e+30 : f32
    %42 = vector.broadcast %cst_26 : f32 to vector<16x128xf32>
    %43 = arith.select %31, %27, %42 : vector<16x128xi1>, vector<16x128xf32>
    %c0_27 = arith.constant 0 : index
    %c0_28 = arith.constant 0 : index
    %44 = vector.load %arg3[%c0_27, %c0_28] : memref<16x1xi32, #tpu.memory_space<vmem>>, vector<16x1xi32>
    %cst_29 = arith.constant dense<0xFF800000> : vector<16xf32>
    %45 = vector.multi_reduction <maximumf>, %41, %cst_29 [1] : vector<16x128xf32> to vector<16xf32>
    %46 = vector.shape_cast %45 : vector<16xf32> to vector<16x1xf32>
    %47 = vector.broadcast %46 : vector<16x1xf32> to vector<16x128xf32>
    %48 = arith.subf %41, %47 : vector<16x128xf32>
    %49 = math.exp %48 : vector<16x128xf32>
    %cst_30 = arith.constant dense<0.000000e+00> : vector<16xf32>
    %50 = vector.multi_reduction <add>, %49, %cst_30 [1] : vector<16x128xf32> to vector<16xf32>
    %51 = vector.shape_cast %50 : vector<16xf32> to vector<16x1xf32>
    %52 = math.log %51 : vector<16x1xf32>
    %53 = arith.addf %52, %46 : vector<16x1xf32>
    %54 = vector.broadcast %44 : vector<16x1xi32> to vector<16x128xi32>
    %55 = arith.cmpi eq, %29, %54 : vector<16x128xi32>
    %cst_31 = arith.constant 0.000000e+00 : f32
    %56 = vector.broadcast %cst_31 : f32 to vector<16x128xf32>
    %57 = arith.select %55, %41, %56 : vector<16x128xi1>, vector<16x128xf32>
    %cst_32 = arith.constant dense<0.000000e+00> : vector<16xf32>
    %58 = vector.multi_reduction <add>, %57, %cst_32 [1] : vector<16x128xf32> to vector<16xf32>
    %59 = vector.shape_cast %58 : vector<16xf32> to vector<16x1xf32>
    %c-100_i32 = arith.constant -100 : i32
    %60 = vector.broadcast %c-100_i32 : i32 to vector<16x1xi32>
    %61 = arith.cmpi ne, %44, %60 : vector<16x1xi32>
    %62 = arith.andi %37, %61 : vector<16x1xi1>
    %63 = arith.extui %62 : vector<16x1xi1> to vector<16x1xi32>
    %64 = arith.sitofp %63 : vector<16x1xi32> to vector<16x1xf32>
    %65 = arith.subf %53, %59 : vector<16x1xf32>
    %66 = arith.mulf %65, %64 : vector<16x1xf32>
    %67 = vector.shape_cast %66 : vector<16x1xf32> to vector<1x16x1xf32>
    %cst_33 = arith.constant dense<0.000000e+00> : vector<1xf32>
    %68 = vector.multi_reduction <add>, %67, %cst_33 [1, 2] : vector<1x16x1xf32> to vector<1xf32>
    %69 = vector.shape_cast %68 : vector<1xf32> to vector<1x1x1xf32>
    %70 = vector.extract %69[0, 0, 0] : f32 from vector<1x1x1xf32>
    %71 = vector.shape_cast %64 : vector<16x1xf32> to vector<1x16x1xf32>
    %cst_34 = arith.constant dense<0.000000e+00> : vector<1xf32>
    %72 = vector.multi_reduction <add>, %71, %cst_34 [1, 2] : vector<1x16x1xf32> to vector<1xf32>
    %73 = vector.shape_cast %72 : vector<1xf32> to vector<1x1x1xf32>
    %74 = vector.extract %73[0, 0, 0] : f32 from vector<1x1x1xf32>
    %cst_35 = arith.constant 5.000000e-01 : f32
    %75 = vector.broadcast %cst_35 : f32 to vector<16x128xf32>
    %76 = arith.mulf %41, %75 : vector<16x128xf32>
    %cst_36 = arith.constant 5.000000e-01 : f32
    %77 = vector.broadcast %cst_36 : f32 to vector<16x128xf32>
    %78 = arith.mulf %43, %77 : vector<16x128xf32>
    %cst_37 = arith.constant dense<0xFF800000> : vector<16xf32>
    %79 = vector.multi_reduction <maximumf>, %76, %cst_37 [1] : vector<16x128xf32> to vector<16xf32>
    %80 = vector.shape_cast %79 : vector<16xf32> to vector<16x1xf32>
    %81 = vector.broadcast %80 : vector<16x1xf32> to vector<16x128xf32>
    %82 = arith.subf %76, %81 : vector<16x128xf32>
    %83 = math.exp %82 : vector<16x128xf32>
    %cst_38 = arith.constant dense<0.000000e+00> : vector<16xf32>
    %84 = vector.multi_reduction <add>, %83, %cst_38 [1] : vector<16x128xf32> to vector<16xf32>
    %85 = vector.shape_cast %84 : vector<16xf32> to vector<16x1xf32>
    %86 = math.log %85 : vector<16x1xf32>
    %87 = vector.broadcast %86 : vector<16x1xf32> to vector<16x128xf32>
    %88 = arith.subf %82, %87 : vector<16x128xf32>
    %cst_39 = arith.constant dense<0xFF800000> : vector<16xf32>
    %89 = vector.multi_reduction <maximumf>, %78, %cst_39 [1] : vector<16x128xf32> to vector<16xf32>
    %90 = vector.shape_cast %89 : vector<16xf32> to vector<16x1xf32>
    %91 = vector.broadcast %90 : vector<16x1xf32> to vector<16x128xf32>
    %92 = arith.subf %78, %91 : vector<16x128xf32>
    %93 = math.exp %92 : vector<16x128xf32>
    %cst_40 = arith.constant dense<0.000000e+00> : vector<16xf32>
    %94 = vector.multi_reduction <add>, %93, %cst_40 [1] : vector<16x128xf32> to vector<16xf32>
    %95 = vector.shape_cast %94 : vector<16xf32> to vector<16x1xf32>
    %96 = math.log %95 : vector<16x1xf32>
    %97 = vector.broadcast %96 : vector<16x1xf32> to vector<16x128xf32>
    %98 = arith.subf %92, %97 : vector<16x128xf32>
    %99 = tpu.reciprocal %95 {approx = true} : vector<16x1xf32> -> vector<16x1xf32>
    %100 = vector.broadcast %99 : vector<16x1xf32> to vector<16x128xf32>
    %101 = arith.mulf %93, %100 : vector<16x128xf32>
    %102 = arith.subf %98, %88 : vector<16x128xf32>
    %103 = arith.mulf %101, %102 : vector<16x128xf32>
    %cst_41 = arith.constant 0.000000e+00 : f32
    %104 = vector.broadcast %cst_41 : f32 to vector<16x128xf32>
    %105 = arith.select %31, %103, %104 : vector<16x128xi1>, vector<16x128xf32>
    %106 = vector.broadcast %39 : vector<16x1xf32> to vector<16x128xf32>
    %107 = arith.mulf %105, %106 : vector<16x128xf32>
    %108 = vector.shape_cast %107 : vector<16x128xf32> to vector<1x16x128xf32>
    %cst_42 = arith.constant dense<0.000000e+00> : vector<1xf32>
    %109 = vector.multi_reduction <add>, %108, %cst_42 [1, 2] : vector<1x16x128xf32> to vector<1xf32>
    %110 = vector.shape_cast %109 : vector<1xf32> to vector<1x1x1xf32>
    %111 = vector.extract %110[0, 0, 0] : f32 from vector<1x1x1xf32>
    %112 = arith.subf %0, %1 : vector<16x128xf32>
    %113 = arith.mulf %112, %112 : vector<16x128xf32>
    %114 = vector.broadcast %39 : vector<16x1xf32> to vector<16x128xf32>
    %115 = arith.mulf %113, %114 : vector<16x128xf32>
    %116 = vector.shape_cast %115 : vector<16x128xf32> to vector<1x16x128xf32>
    %cst_43 = arith.constant dense<0.000000e+00> : vector<1xf32>
    %117 = vector.multi_reduction <add>, %116, %cst_43 [1, 2] : vector<1x16x128xf32> to vector<1xf32>
    %118 = vector.shape_cast %117 : vector<1xf32> to vector<1x1x1xf32>
    %119 = vector.extract %118[0, 0, 0] : f32 from vector<1x1x1xf32>
    %120 = arith.mulf %1, %1 : vector<16x128xf32>
    %121 = vector.broadcast %39 : vector<16x1xf32> to vector<16x128xf32>
    %122 = arith.mulf %120, %121 : vector<16x128xf32>
    %123 = vector.shape_cast %122 : vector<16x128xf32> to vector<1x16x128xf32>
    %cst_44 = arith.constant dense<0.000000e+00> : vector<1xf32>
    %124 = vector.multi_reduction <add>, %123, %cst_44 [1, 2] : vector<1x16x128xf32> to vector<1xf32>
    %125 = vector.shape_cast %124 : vector<1xf32> to vector<1x1x1xf32>
    %126 = vector.extract %125[0, 0, 0] : f32 from vector<1x1x1xf32>
    %127 = arith.subf %8, %21 : vector<16x128xf32>
    %128 = arith.mulf %127, %127 : vector<16x128xf32>
    %129 = vector.broadcast %39 : vector<16x1xf32> to vector<16x128xf32>
    %130 = arith.mulf %128, %129 : vector<16x128xf32>
    %131 = vector.shape_cast %130 : vector<16x128xf32> to vector<1x16x128xf32>
    %cst_45 = arith.constant dense<0.000000e+00> : vector<1xf32>
    %132 = vector.multi_reduction <add>, %131, %cst_45 [1, 2] : vector<1x16x128xf32> to vector<1xf32>
    %133 = vector.shape_cast %132 : vector<1xf32> to vector<1x1x1xf32>
    %134 = vector.extract %133[0, 0, 0] : f32 from vector<1x1x1xf32>
    %135 = arith.mulf %21, %21 : vector<16x128xf32>
    %136 = vector.broadcast %39 : vector<16x1xf32> to vector<16x128xf32>
    %137 = arith.mulf %135, %136 : vector<16x128xf32>
    %138 = vector.shape_cast %137 : vector<16x128xf32> to vector<1x16x128xf32>
    %cst_46 = arith.constant dense<0.000000e+00> : vector<1xf32>
    %139 = vector.multi_reduction <add>, %138, %cst_46 [1, 2] : vector<1x16x128xf32> to vector<1xf32>
    %140 = vector.shape_cast %139 : vector<1xf32> to vector<1x1x1xf32>
    %141 = vector.extract %140[0, 0, 0] : f32 from vector<1x1x1xf32>
    %142 = tpu.iota {dimensions = array<i32: 1>} : vector<8x128xi32>
    %143 = tpu.iota {dimensions = array<i32: 0>} : vector<8x128xi32>
    %c0_i32 = arith.constant 0 : i32
    %144 = vector.broadcast %c0_i32 : i32 to vector<8x128xi32>
    %145 = arith.cmpi eq, %143, %144 : vector<8x128xi32>
    %cst_47 = arith.constant 0.000000e+00 : f32
    %146 = vector.broadcast %cst_47 : f32 to vector<8x128xf32>
    %c0_i32_48 = arith.constant 0 : i32
    %147 = vector.broadcast %c0_i32_48 : i32 to vector<8x128xi32>
    %148 = arith.cmpi eq, %142, %147 : vector<8x128xi32>
    %149 = arith.andi %145, %148 : vector<8x128xi1>
    %cst_49 = arith.constant 0.000000e+00 : f32
    %150 = vector.broadcast %70 : f32 to vector<8x128xf32>
    %151 = vector.broadcast %cst_49 : f32 to vector<8x128xf32>
    %152 = arith.select %149, %150, %151 : vector<8x128xi1>, vector<8x128xf32>
    %153 = arith.addf %146, %152 : vector<8x128xf32>
    %c1_i32 = arith.constant 1 : i32
    %154 = vector.broadcast %c1_i32 : i32 to vector<8x128xi32>
    %155 = arith.cmpi eq, %142, %154 : vector<8x128xi32>
    %156 = arith.andi %145, %155 : vector<8x128xi1>
    %cst_50 = arith.constant 0.000000e+00 : f32
    %157 = vector.broadcast %74 : f32 to vector<8x128xf32>
    %158 = vector.broadcast %cst_50 : f32 to vector<8x128xf32>
    %159 = arith.select %156, %157, %158 : vector<8x128xi1>, vector<8x128xf32>
    %160 = arith.addf %153, %159 : vector<8x128xf32>
    %c2_i32 = arith.constant 2 : i32
    %161 = vector.broadcast %c2_i32 : i32 to vector<8x128xi32>
    %162 = arith.cmpi eq, %142, %161 : vector<8x128xi32>
    %163 = arith.andi %145, %162 : vector<8x128xi1>
    %cst_51 = arith.constant 0.000000e+00 : f32
    %164 = vector.broadcast %111 : f32 to vector<8x128xf32>
    %165 = vector.broadcast %cst_51 : f32 to vector<8x128xf32>
    %166 = arith.select %163, %164, %165 : vector<8x128xi1>, vector<8x128xf32>
    %167 = arith.addf %160, %166 : vector<8x128xf32>
    %c3_i32 = arith.constant 3 : i32
    %168 = vector.broadcast %c3_i32 : i32 to vector<8x128xi32>
    %169 = arith.cmpi eq, %142, %168 : vector<8x128xi32>
    %170 = arith.andi %145, %169 : vector<8x128xi1>
    %cst_52 = arith.constant 0.000000e+00 : f32
    %171 = vector.broadcast %119 : f32 to vector<8x128xf32>
    %172 = vector.broadcast %cst_52 : f32 to vector<8x128xf32>
    %173 = arith.select %170, %171, %172 : vector<8x128xi1>, vector<8x128xf32>
    %174 = arith.addf %167, %173 : vector<8x128xf32>
    %c4_i32 = arith.constant 4 : i32
    %175 = vector.broadcast %c4_i32 : i32 to vector<8x128xi32>
    %176 = arith.cmpi eq, %142, %175 : vector<8x128xi32>
    %177 = arith.andi %145, %176 : vector<8x128xi1>
    %cst_53 = arith.constant 0.000000e+00 : f32
    %178 = vector.broadcast %126 : f32 to vector<8x128xf32>
    %179 = vector.broadcast %cst_53 : f32 to vector<8x128xf32>
    %180 = arith.select %177, %178, %179 : vector<8x128xi1>, vector<8x128xf32>
    %181 = arith.addf %174, %180 : vector<8x128xf32>
    %c5_i32 = arith.constant 5 : i32
    %182 = vector.broadcast %c5_i32 : i32 to vector<8x128xi32>
    %183 = arith.cmpi eq, %142, %182 : vector<8x128xi32>
    %184 = arith.andi %145, %183 : vector<8x128xi1>
    %cst_54 = arith.constant 0.000000e+00 : f32
    %185 = vector.broadcast %134 : f32 to vector<8x128xf32>
    %186 = vector.broadcast %cst_54 : f32 to vector<8x128xf32>
    %187 = arith.select %184, %185, %186 : vector<8x128xi1>, vector<8x128xf32>
    %188 = arith.addf %181, %187 : vector<8x128xf32>
    %c6_i32 = arith.constant 6 : i32
    %189 = vector.broadcast %c6_i32 : i32 to vector<8x128xi32>
    %190 = arith.cmpi eq, %142, %189 : vector<8x128xi32>
    %191 = arith.andi %145, %190 : vector<8x128xi1>
    %cst_55 = arith.constant 0.000000e+00 : f32
    %192 = vector.broadcast %141 : f32 to vector<8x128xf32>
    %193 = vector.broadcast %cst_55 : f32 to vector<8x128xf32>
    %194 = arith.select %191, %192, %193 : vector<8x128xi1>, vector<8x128xf32>
    %195 = arith.addf %188, %194 : vector<8x128xf32>
    %c0_56 = arith.constant 0 : index
    %c0_57 = arith.constant 0 : index
    %196 = vector.load %arg13[%c0_56, %c0_57] : memref<8x128xf32, #tpu.memory_space<vmem>>, vector<8x128xf32>
    tpu.vector_store %arg13[%c0_56, %c0_57], %195 {strides = array<i32>} : memref<8x128xf32, #tpu.memory_space<vmem>>, vector<8x128xf32>,
    return
  }
  func.func @transform_0(%arg0: i32) -> (i32, i32) {
    %c0_i32 = arith.constant 0 : i32
    %c0_i32_0 = arith.constant 0 : i32
    return %arg0, %c0_i32 : i32, i32
  }
  func.func @transform_1(%arg0: i32) -> (i32, i32) {
    %c0_i32 = arith.constant 0 : i32
    %c0_i32_0 = arith.constant 0 : i32
    return %arg0, %c0_i32 : i32, i32
  }
  func.func @transform_2(%arg0: i32) -> (i32, i32) {
    %c0_i32 = arith.constant 0 : i32
    %c0_i32_0 = arith.constant 0 : i32
    return %arg0, %c0_i32 : i32, i32
  }
  func.func @transform_3(%arg0: i32) -> (i32, i32) {
    %c0_i32 = arith.constant 0 : i32
    %c0_i32_0 = arith.constant 0 : i32
    %c0_i32_1 = arith.constant 0 : i32
    return %c0_i32, %c0_i32_0 : i32, i32
  }
  func.func @transform_4(%arg0: i32) -> (i32, i32) {
    %c0_i32 = arith.constant 0 : i32
    %c0_i32_0 = arith.constant 0 : i32
    %c0_i32_1 = arith.constant 0 : i32
    return %c0_i32, %c0_i32_0 : i32, i32
  }
  func.func @transform_5(%arg0: i32) -> (i32, i32) {
    %c0_i32 = arith.constant 0 : i32
    %c0_i32_0 = arith.constant 0 : i32
    %c0_i32_1 = arith.constant 0 : i32
    return %c0_i32, %c0_i32_0 : i32, i32
  }
  func.func @transform_6(%arg0: i32) -> (i32, i32) {
    %c0_i32 = arith.constant 0 : i32
    %c0_i32_0 = arith.constant 0 : i32
    %c0_i32_1 = arith.constant 0 : i32
    return %c0_i32, %c0_i32_0 : i32, i32
  }
  func.func @transform_7(%arg0: i32) -> (i32, i32) {
    %c0_i32 = arith.constant 0 : i32
    %c0_i32_0 = arith.constant 0 : i32
    %c0_i32_1 = arith.constant 0 : i32
    return %c0_i32, %c0_i32_0 : i32, i32
  }
  func.func @transform_8(%arg0: i32) -> (i32, i32) {
    %c0_i32 = arith.constant 0 : i32
    %c0_i32_0 = arith.constant 0 : i32
    %c0_i32_1 = arith.constant 0 : i32
    return %c0_i32, %c0_i32_0 : i32, i32
  }
  func.func @transform_9(%arg0: i32) -> (i32, i32) {
    %c0_i32 = arith.constant 0 : i32
    %c0_i32_0 = arith.constant 0 : i32
    %c0_i32_1 = arith.constant 0 : i32
    return %c0_i32, %c0_i32_0 : i32, i32
  }
  func.func @transform_10(%arg0: i32) -> (i32, i32) {
    %c0_i32 = arith.constant 0 : i32
    %c0_i32_0 = arith.constant 0 : i32
    %c0_i32_1 = arith.constant 0 : i32
    return %c0_i32, %c0_i32_0 : i32, i32
  }
  func.func @transform_11(%arg0: i32) -> (i32, i32) {
    %c0_i32 = arith.constant 0 : i32
    %c0_i32_0 = arith.constant 0 : i32
    return %arg0, %c0_i32 : i32, i32
  }
  func.func @transform_12(%arg0: i32) -> (i32, i32) {
    %c0_i32 = arith.constant 0 : i32
    %c0_i32_0 = arith.constant 0 : i32
    return %arg0, %c0_i32 : i32, i32
  }
}

</mosaic_0001>

<bundles_post_ra>
// kernel: tpu_custom_call.1
= control target key start
LH: loop header
LB: loop body
LE: loop exit
PB: predicated region body
PF: predicated region fallthrough
CT: control target
= control target key end

     0   :  { %18 = vsyncpa [#allocation3], 0  ;;  %s1555_s0 = inlined_call_operand.vmem [shape: f32[16,128], index: 0, kind: input, shape index: {}]   ;;  %s1556_s1 = inlined_call_operand.hbm [shape: f32[16,128], index: 1, kind: input, shape index: {}]   ;;  %s1557_s2 = inlined_call_operand.vmem [shape: s32[16,1], index: 2, kind: input, shape index: {}]   ;;  %s1558_s3 = inlined_call_operand.hbm [shape: bf16[128,128], index: 3, kind: input, shape index: {}]   ;;  %s1559_s4 = inlined_call_operand.vmem [shape: f32[1,128], index: 4, kind: input, shape index: {}]   ;;  %s1560_s5 = inlined_call_operand.hbm [shape: bf16[128,128], index: 5, kind: input, shape index: {}]   ;;  %s1561_s6 = inlined_call_operand.vmem [shape: f32[1,128], index: 6, kind: input, shape index: {}]   ;;  %s1562_s7 = inlined_call_operand.hbm [shape: bf16[128,128], index: 7, kind: input, shape index: {}]   ;;  %s1563_s8 = inlined_call_operand.vmem [shape: f32[1,128], index: 8, kind: input, shape index: {}]   ;;  %s1564_s9 = inlined_call_operand.hbm [shape: bf16[128,128], index: 9, kind: input, shape index: {}]   ;;  %s1565_s10 = inlined_call_operand.vmem [shape: f32[1,128], index: 10, kind: input, shape index: {}]   ;;  %s1566_s11 = inlined_call_operand.hbm [shape: f32[16,128], index: 11, kind: output, shape index: {0}]   ;;  %s1567_s12 = inlined_call_operand.hbm [shape: f32[8,128], index: 12, kind: output, shape index: {1}]  }
   0x1   :  { %19 = vsyncpa [#allocation6], 0 }
   0x2   :  { %20 = vsyncpa [#allocation9], 0 }
   0x3   :  { %21 = vsyncpa [#allocation4], 0 }
   0x4   :  { %22 = vsyncpa [#allocation13], 0  ;;  %s1264_s21 = smov [#allocation5]  }
   0x5   :  { %s44_s22 = sshll.u32 %s1264_s21, 4  ;;  %s45_s22 = int_to_ptr.vmem [resolvable:$true] %s44_s22 }
   0x6   :  { %s1122_s23 = scalar_lea.vmem %s45_s22, 1024  ;;  %p1127_p1 = scmp.lt.s32.totalorder %s45_s22, %s45_s22 }
   0x7   :  { %p1123_p0 = scmp.ne.s32.totalorder %s45_s22, %s1122_s23  ;;  %p1128_p2 = scmp.lt.s32.totalorder %s1122_s23, %s1122_s23 }
   0x9   :  { %p1129_p3 = por %p1128_p2, %p1127_p1 }
   0xb   :  { %p1130_p4 = pnand %p1129_p3, %p1123_p0 }
   0xd   :  { %1133 = shalt.err (!%p1130_p4)
}
   0xe   :  { %s1265_s24 = smov 64   ;;  %s1266_s25 = smov 4  }
   0xf   :  { %50 = dma.hbm_to_vmem [thread:$0]  %s1558_s3, 1024, %s45_s22, [#allocation6], %s1265_s24, %s1265_s24, %s1266_s25  }
  0x10   :  { %s1267_s28 = smov [#allocation8]   ;;  %s1268_s30 = smov [#allocation2]  }
  0x11   :  { %s72_s29 = sshll.u32 %s1267_s28, 4  ;;  %s30_s13 = sshll.u32 %s1268_s30, 4  ;;  %s73_s29 = int_to_ptr.vmem [resolvable:$true] %s72_s29  ;;  %s31_s13 = int_to_ptr.vmem [resolvable:$true] %s30_s13 }
  0x12   :  { %s1142_s14 = scalar_lea.vmem %s73_s29, 1024  ;;  %p1147_p6 = scmp.lt.s32.totalorder %s73_s29, %s73_s29 }
  0x13   :  { %p1143_p5 = scmp.ne.s32.totalorder %s73_s29, %s1142_s14  ;;  %p1148_p7 = scmp.lt.s32.totalorder %s1142_s14, %s1142_s14 }
  0x15   :  { %p1149_p8 = por %p1148_p7, %p1147_p6 }
  0x17   :  { %p1150_p9 = pnand %p1149_p8, %p1143_p5 }
  0x19   :  { %1153 = shalt.err (!%p1150_p9)
}
  0x1a   :  { %78 = dma.hbm_to_vmem [thread:$0]  %s1562_s7, 1024, %s73_s29, [#allocation9], %s1265_s24, %s1265_s24, %s1266_s25  }
  0x1b   :  { %s1162_s3 = scalar_lea.vmem %s31_s13, 256  ;;  %p1167_p11 = scmp.lt.s32.totalorder %s31_s13, %s31_s13 }
  0x1c   :  { %p1163_p10 = scmp.ne.s32.totalorder %s31_s13, %s1162_s3  ;;  %p1168_p12 = scmp.lt.s32.totalorder %s1162_s3, %s1162_s3 }
  0x1e   :  { %p1169_p13 = por %p1168_p12, %p1167_p11 }
  0x20   :  { %p1170_p0 = pnand %p1169_p13, %p1163_p10 }
  0x22   :  { %1173 = shalt.err (!%p1170_p0)
}
  0x23   :  { %s1269_s17 = smov 128   ;;  %s1270_s18 = smov 8  }
  0x24   :  { %36 = dma.hbm_to_vmem [thread:$0]  %s1556_s1, 256, %s31_s13, [#allocation3], %s1269_s17, %s1269_s17, %s1270_s18  }
  0x25   :  { %s1271_s21 = smov [#allocation7]   ;;  %s1272_s7 = smov [#allocation10]  }
  0x26   :  { %s58_s22 = sshll.u32 %s1271_s21, 4  ;;  %s86_s23 = sshll.u32 %s1272_s7, 4  ;;  %s59_s22 = int_to_ptr.vmem [resolvable:$true] %s58_s22  ;;  %s87_s23 = int_to_ptr.vmem [resolvable:$true] %s86_s23 }
  0x27   :  { %s1182_s26 = scalar_lea.vmem %s59_s22, 1024  ;;  %p1187_p2 = scmp.lt.s32.totalorder %s59_s22, %s59_s22 }
  0x28   :  { %p1183_p1 = scmp.ne.s32.totalorder %s59_s22, %s1182_s26  ;;  %p1188_p3 = scmp.lt.s32.totalorder %s1182_s26, %s1182_s26 }
  0x2a   :  { %p1189_p4 = por %p1188_p3, %p1187_p2 }
  0x2c   :  { %p1190_p5 = pnand %p1189_p4, %p1183_p1 }
  0x2e   :  { %1193 = shalt.err (!%p1190_p5)
}
  0x2f   :  { %64 = dma.hbm_to_vmem [thread:$0]  %s1560_s5, 1024, %s59_s22, [#allocation6], %s1265_s24, %s1265_s24, %s1266_s25  }
  0x30   :  { %s1202_s1 = scalar_lea.vmem %s87_s23, 1024  ;;  %p1207_p7 = scmp.lt.s32.totalorder %s87_s23, %s87_s23 }
  0x31   :  { %p1203_p6 = scmp.ne.s32.totalorder %s87_s23, %s1202_s1  ;;  %p1208_p8 = scmp.lt.s32.totalorder %s1202_s1, %s1202_s1 }
  0x33   :  { %p1209_p9 = por %p1208_p8, %p1207_p7 }
  0x35   :  { %p1210_p10 = pnand %p1209_p9, %p1203_p6 }
  0x37   :  { %1213 = shalt.err (!%p1210_p10)
}
  0x38   :  { %92 = dma.hbm_to_vmem [thread:$0]  %s1564_s9, 1024, %s87_s23, [#allocation9], %s1265_s24, %s1265_s24, %s1266_s25  }
  0x39   :  { %1254 = dma.done.wait [#allocation3], 256  }
  0x3a   :  { %1255 = vsyncadd [#allocation3], 4294967040 }
  0x3b   :  { %1256 = dma.done.wait [#allocation6], 2048  }
  0x3c   :  { %1257 = vsyncadd [#allocation6], 4294965248 }
  0x3d   :  { %1258 = dma.done.wait [#allocation9], 2048  }
  0x3e   :  { %1259 = vsyncadd [#allocation9], 4294965248  ;;  %v1273_v0 = vmov 0.0   ;;  %vm1274_vm0 = vmmov 0   ;;  %v1046_v1 = vld [vmem:[#allocation5 + $0x38] sm:$0xff]   ;;  %v1047_v2 = vld [vmem:[#allocation5 + $0x30] sm:$0xff]  }
  0x3f   :  { %936 = vmatprep.subr.bf16.mxu0 %v1273_v0  ;;  %952 = vmatprep.mubr.msk.bf16.mxu0 %vm1274_vm0, %v1273_v0  ;;  %v1048_v3 = vld [vmem:[#allocation5 + $0x28] sm:$0xff]   ;;  %v1049_v4 = vld [vmem:[#allocation5 + $0x20] sm:$0xff]   ;;  %v1050_v5 = vld [vmem:[#allocation5 + $0x18] sm:$0xff]   ;;  %vm641_vm5 = vcmask 7168  }
  0x40   :  { %956 = vmatprep.subr.bf16.mxu1 %v1273_v0  ;;  %972 = vmatprep.mubr.msk.bf16.mxu1 %vm1274_vm0, %v1273_v0  ;;  %v1051_v6 = vld [vmem:[#allocation5 + $0x10] sm:$0xff]   ;;  %v1062_v7 = vld [vmem:[#allocation7 + $0x38] sm:$0xff]   ;;  %v1052_v9 = vld [vmem:[#allocation5 + $0x8] sm:$0xff]  }
  0x41   :  { %937 = vmatpush3.bf16.msra.mxu0 %v1046_v1  ;;  %v1063_v8 = vld [vmem:[#allocation7 + $0x30] sm:$0xff]   ;;  %957 = vmatpush3.bf16.msra.mxu1 %v1062_v7  ;;  %v1053_v10 = vld [vmem:[#allocation5] sm:$0xff]   ;;  %v1394_v12 = vld [vmem:[%s1555_s0 + $0x8] sm:$0xff] }
  0x42   :  { %938 = vmatprep.subr.bf16.mxu0 %v1273_v0  ;;  %958 = vmatprep.subr.bf16.mxu1 %v1273_v0  ;;  %v1389_v11 = vld [vmem:[%s1555_s0] sm:$0xff]  ;;  %v1054_v14 = vld [vmem:[#allocation8 + $0x38] sm:$0xff]   ;;  %v1056_v16 = vld [vmem:[#allocation8 + $0x28] sm:$0xff]  }
  0x43   :  { %v115_v13 = vpack.c.bf16 %v1394_v12, %v1389_v11  ;;  %v1055_v15 = vld [vmem:[#allocation8 + $0x30] sm:$0xff]   ;;  %v1057_v17 = vld [vmem:[#allocation8 + $0x20] sm:$0xff]   ;;  %v1058_v18 = vld [vmem:[#allocation8 + $0x18] sm:$0xff]  }
  0x44   :  { %v1059_v19 = vld [vmem:[#allocation8 + $0x10] sm:$0xff]   ;;  %v1060_v20 = vld [vmem:[#allocation8 + $0x8] sm:$0xff]   ;;  %v1061_v21 = vld [vmem:[#allocation8] sm:$0xff]  }
  0x45   :  { %939 = vmatpush3.bf16.msra.mxu0 %v1047_v2  ;;  %959 = vmatpush3.bf16.msra.mxu1 %v1063_v8  ;;  %v1409_v22 = vld [vmem:[#allocation2] sm:$0xff]  ;;  %v1411_v23 = vld [vmem:[#allocation2 + $0x8] sm:$0xff]  ;;  %v1064_v25 = vld [vmem:[#allocation7 + $0x28] sm:$0xff]  }
  0x46   :  { %940 = vmatprep.subr.bf16.mxu0 %v1273_v0  ;;  %960 = vmatprep.subr.bf16.mxu1 %v1273_v0  ;;  %v343_v24 = vpack.c.bf16 %v1411_v23, %v1409_v22  ;;  %v1065_v26 = vld [vmem:[#allocation7 + $0x20] sm:$0xff]   ;;  %v1066_v27 = vld [vmem:[#allocation7 + $0x18] sm:$0xff]   ;;  %v1067_v28 = vld [vmem:[#allocation7 + $0x10] sm:$0xff]  }
  0x47   :  { %v1068_v29 = vld [vmem:[#allocation7 + $0x8] sm:$0xff]   ;;  %v1069_v30 = vld [vmem:[#allocation7] sm:$0xff]   ;;  %v862_v31 = vld [vmem:[%s1559_s4] ss:$0 sm:$0xff] }
  0x48   :  { %v1070_v40 = vld [vmem:[#allocation10 + $0x38] sm:$0xff]   ;;  %v1071_v42 = vld [vmem:[#allocation10 + $0x30] sm:$0xff]   ;;  %v1072_v43 = vld [vmem:[#allocation10 + $0x28] sm:$0xff]  }
  0x49   :  { %941 = vmatpush3.bf16.msra.mxu0 %v1048_v3  ;;  %961 = vmatpush3.bf16.msra.mxu1 %v1064_v25  ;;  %v880_v44 = vld [vmem:[%s1563_s8] ss:$0 sm:$0xff]  ;;  %v1073_v46 = vld [vmem:[#allocation10 + $0x20] sm:$0xff]   ;;  %v1074_v50 = vld [vmem:[#allocation10 + $0x18] sm:$0xff]  }
  0x4a   :  { %942 = vmatprep.subr.bf16.mxu0 %v1273_v0  ;;  %962 = vmatprep.subr.bf16.mxu1 %v1273_v0  ;;  %v1075_v53 = vld [vmem:[#allocation10 + $0x10] sm:$0xff]   ;;  %v1076_v54 = vld [vmem:[#allocation10 + $0x8] sm:$0xff]   ;;  %v1077_v56 = vld [vmem:[#allocation10] sm:$0xff]  }
  0x4b   :  { %v871_v7 = vld [vmem:[%s1561_s6] ss:$0 sm:$0xff] }
  0x4d   :  { %943 = vmatpush3.bf16.msra.mxu0 %v1049_v4  ;;  %963 = vmatpush3.bf16.msra.mxu1 %v1065_v26  ;;  %v1275_v4 = vmov 0  }
  0x4e   :  { %944 = vmatprep.subr.bf16.mxu0 %v1273_v0  ;;  %964 = vmatprep.subr.bf16.mxu1 %v1273_v0 }
  0x4f   :  { %1045 = vset.pattern.permute.xlu1 %v1275_v4  ;;  %1044 = vset.pattern.permute.xlu0 %v1275_v4  ;;  %v733_v4 = vsub.f32 %v1394_v12, %v1411_v23 }
  0x51   :  { %945 = vmatpush3.bf16.msra.mxu0 %v1050_v5  ;;  %965 = vmatpush3.bf16.msra.mxu1 %v1066_v27  ;;  %v573_v5 = vlaneseq }
  0x52   :  { %946 = vmatprep.subr.bf16.mxu0 %v1273_v0  ;;  %966 = vmatprep.subr.bf16.mxu1 %v1273_v0 }
  0x55   :  { %947 = vmatpush3.bf16.msra.mxu0 %v1051_v6  ;;  %967 = vmatpush3.bf16.msra.mxu1 %v1067_v28  ;;  %v1442_v6 = vand.u32 127, %v573_v5 }
  0x56   :  { %948 = vmatprep.subr.bf16.mxu0 %v1273_v0  ;;  %968 = vmatprep.subr.bf16.mxu1 %v1273_v0 }
  0x57   :  { %vm575_vm1 = vcmp.lt.s32.totalorder %v1442_v6, 64 }
  0x59   :  { %949 = vmatpush3.bf16.msra.mxu0 %v1052_v9  ;;  %969 = vmatpush3.bf16.msra.mxu1 %v1068_v29 }
  0x5a   :  { %950 = vmatprep.subr.bf16.mxu0 %v1273_v0  ;;  %970 = vmatprep.subr.bf16.mxu1 %v1273_v0 }
  0x5d   :  { %951 = vmatpush3.bf16.msra.mxu0 %v1053_v10  ;;  %971 = vmatpush3.bf16.msra.mxu1 %v1069_v30 }
  0x5e   :  { %976 = vmatprep.subr.bf16.mxu0 %v1273_v0  ;;  %996 = vmatprep.subr.bf16.mxu1 %v1273_v0 }
  0x60   :  { %953 = vmatmul.mubr.bf16.vlgmr.msra.gmra.mxu0 %v115_v13 }
  0x61   :  { %977 = vmatpush3.bf16.msra.mxu0 %v1054_v14  ;;  %992 = vmatprep.mubr.msk.bf16.mxu0 %vm1274_vm0, %v1273_v0 }
  0x62   :  { %978 = vmatprep.subr.bf16.mxu0 %v1273_v0 }
  0x65   :  { %979 = vmatpush3.bf16.msra.mxu0 %v1055_v15 }
  0x66   :  { %980 = vmatprep.subr.bf16.mxu0 %v1273_v0 }
  0x69   :  { %981 = vmatpush3.bf16.msra.mxu0 %v1056_v16 }
  0x6a   :  { %982 = vmatprep.subr.bf16.mxu0 %v1273_v0 }
  0x6d   :  { %983 = vmatpush3.bf16.msra.mxu0 %v1057_v17 }
  0x6e   :  { %984 = vmatprep.subr.bf16.mxu0 %v1273_v0 }
  0x71   :  { %985 = vmatpush3.bf16.msra.mxu0 %v1058_v18 }
  0x72   :  { %986 = vmatprep.subr.bf16.mxu0 %v1273_v0 }
  0x75   :  { %987 = vmatpush3.bf16.msra.mxu0 %v1059_v19 }
  0x76   :  { %988 = vmatprep.subr.bf16.mxu0 %v1273_v0 }
  0x79   :  { %989 = vmatpush3.bf16.msra.mxu0 %v1060_v20  ;;  %v889_v20 = vld [vmem:[%s1565_s10] ss:$0 sm:$0xff] }
  0x7a   :  { %990 = vmatprep.subr.bf16.mxu0 %v1273_v0 }
  0x7d   :  { %991 = vmatpush3.bf16.msra.mxu0 %v1061_v21 }
  0x80   :  { %993 = vmatmul.mubr.bf16.vlgmr.msra.gmra.mxu0 %v343_v24 }
 0x120   :  { %v221_v32 = vpop.f32.mrf.mxu0 }
 0x121   :  { %v222_v33 = vadd.f32 %v862_v31, %v221_v32 }
 0x122   :  { %v954_v34 = vpop.f32.mrf.mxu0 }
 0x123   :  { %1078 = vtanh.f32 %v222_v33  ;;  %v594_v33 = vld [vmem:[%s1557_s2 + $0x8] sm:$0xff]  ;;  %v593_v34 = vld [vmem:[%s1557_s2] sm:$0xff]  ;;  %s1276_s2 = smov [#allocation11]  }
 0x124   :  { %v224_v35 = vpop.f32.mrf.mxu0  ;;  %vm629_vm2 = vcmp.ne.s32.totalorder %v593_v34, 4294967196  ;;  %vm630_vm3 = vcmp.ne.s32.totalorder %v594_v33, 4294967196  ;;  %s834_s21 = sshll.u32 %s1276_s2, 4  ;;  %s835_s21 = int_to_ptr.vmem [resolvable:$true] %s834_s21 }
 0x125   :  { %v225_v36 = vadd.f32 %v862_v31, %v224_v35  ;;  %s1214_s22 = scalar_lea.vmem %s835_s21, 256  ;;  %p1219_p12 = scmp.lt.s32.totalorder %s835_s21, %s835_s21 }
 0x126   :  { %v955_v37 = vpop.f32.mrf.mxu0  ;;  %p1215_p11 = scmp.ne.s32.totalorder %s835_s21, %s1214_s22  ;;  %p1220_p13 = scmp.lt.s32.totalorder %s1214_s22, %s1214_s22 }
 0x127   :  { %1080 = vtanh.f32 %v225_v36 }
 0x128   :  { %p1221_p0 = por %p1220_p13, %p1219_p12 }
 0x12a   :  { %p1222_p1 = pnand %p1221_p0, %p1215_p11 }
 0x130   :  { %v1079_v38 = vpop.eup %1078 }
 0x134   :  { %v1081_v39 = vpop.eup %1080 }
 0x135   :  { %v230_v41 = vpack.c.bf16 %v1081_v39, %v1079_v38 }
 0x137   :  { %973 = vmatmul.mubr.bf16.vlgmr.msra.gmra.mxu1 %v230_v41 }
 0x138   :  { %997 = vmatpush3.bf16.msra.mxu1 %v1070_v40  ;;  %1012 = vmatprep.mubr.msk.bf16.mxu1 %vm1274_vm0, %v1273_v0 }
 0x139   :  { %998 = vmatprep.subr.bf16.mxu1 %v1273_v0 }
 0x13c   :  { %999 = vmatpush3.bf16.msra.mxu1 %v1071_v42 }
 0x13d   :  { %1000 = vmatprep.subr.bf16.mxu1 %v1273_v0 }
 0x140   :  { %v449_v45 = vpop.f32.mrf.mxu0  ;;  %1001 = vmatpush3.bf16.msra.mxu1 %v1072_v43 }
 0x141   :  { %v450_v47 = vadd.f32 %v880_v44, %v449_v45  ;;  %1002 = vmatprep.subr.bf16.mxu1 %v1273_v0 }
 0x142   :  { %v994_v48 = vpop.f32.mrf.mxu0 }
 0x143   :  { %1082 = vtanh.f32 %v450_v47 }
 0x144   :  { %v452_v49 = vpop.f32.mrf.mxu0  ;;  %1003 = vmatpush3.bf16.msra.mxu1 %v1073_v46 }
 0x145   :  { %v453_v51 = vadd.f32 %v880_v44, %v452_v49  ;;  %1004 = vmatprep.subr.bf16.mxu1 %v1273_v0 }
 0x146   :  { %v995_v52 = vpop.f32.mrf.mxu0 }
 0x147   :  { %1084 = vtanh.f32 %v453_v51 }
 0x148   :  { %1005 = vmatpush3.bf16.msra.mxu1 %v1074_v50 }
 0x149   :  { %1006 = vmatprep.subr.bf16.mxu1 %v1273_v0 }
 0x14c   :  { %1007 = vmatpush3.bf16.msra.mxu1 %v1075_v53 }
 0x14d   :  { %1008 = vmatprep.subr.bf16.mxu1 %v1273_v0 }
 0x150   :  { %v1083_v55 = vpop.eup %1082  ;;  %1009 = vmatpush3.bf16.msra.mxu1 %v1076_v54 }
 0x151   :  { %1010 = vmatprep.subr.bf16.mxu1 %v1273_v0  ;;  %v762_v57 = vsub.f32 %v1079_v38, %v1083_v55  ;;  %v778_v61 = vmul.f32 %v1083_v55, %v1083_v55 }
 0x153   :  { %v764_v63 = vmul.f32 %v762_v57, %v762_v57 }
 0x154   :  { %v1085_v58 = vpop.eup %1084  ;;  %1011 = vmatpush3.bf16.msra.mxu1 %v1077_v56 }
 0x155   :  { %v458_v59 = vpack.c.bf16 %v1085_v58, %v1083_v55  ;;  %v763_v60 = vsub.f32 %v1081_v39, %v1085_v58  ;;  %v779_v62 = vmul.f32 %v1085_v58, %v1085_v58 }
 0x157   :  { %1013 = vmatmul.mubr.bf16.vlgmr.msra.gmra.mxu1 %v458_v59  ;;  %v765_v1 = vmul.f32 %v763_v60, %v763_v60  ;;  %v1437_v2 = vadd.f32 %v779_v62, %v778_v61  ;;  %v898_v61 = vsel %vm629_vm2, 1.0, %v1273_v0  ;;  %v899_v62 = vsel %vm630_vm3, 1.0, %v1273_v0 }
 0x159   :  { %v1439_v3 = vadd.f32 %v765_v1, %v764_v63  ;;  %v732_v1 = vsub.f32 %v1389_v11, %v1409_v22 }
 0x1f7   :  { %v336_v8 = vpop.f32.mrf.mxu1 }
 0x1f8   :  { %v337_v9 = vadd.f32 %v871_v7, %v336_v8  ;;  %v655_v8 = vsel %vm641_vm5, %v899_v62, 0.0 }
 0x1f9   :  { %v974_v10 = vpop.f32.mrf.mxu1 }
 0x1fa   :  { %571 = vst [vmem:[#allocation11] sm:$0xff] %v337_v9  ;;  %v1450_v13 = vsel %vm575_vm1, %v337_v9, -1e+30  ;;  %v734_v10 = vmul.f32 %v732_v1, %v732_v1 }
 0x1fb   :  { %595 = vmax.xlane.f32.xlu0 %v1450_v13  ;;  %v339_v14 = vpop.f32.mrf.mxu1  ;;  %v666_v15 = vmul.f32 0.5, %v1450_v13 }
 0x1fc   :  { %v340_v16 = vadd.f32 %v871_v7, %v339_v14  ;;  %v654_v7 = vsel %vm641_vm5, %v898_v61, 0.0  ;;  %v735_v14 = vmul.f32 %v733_v4, %v733_v4 }
 0x1fd   :  { %670 = vmax.xlane.f32.xlu1 %v666_v15  ;;  %v975_v17 = vpop.f32.mrf.mxu1  ;;  %v656_v0 = vadd.f32 %v655_v8, %v654_v7 }
 0x1fe   :  { %572 = vst [vmem:[#allocation11 + $0x8] sm:$0xff] %v340_v16  ;;  %v1456_v18 = vsel %vm575_vm1, %v340_v16, -1e+30 }
 0x1ff   :  { %597 = vmax.xlane.f32.xlu0 %v1456_v18  ;;  %v667_v19 = vmul.f32 0.5, %v1456_v18 }
 0x201   :  { %672 = vmax.xlane.f32.xlu1 %v667_v19 }
 0x217   :  { %v564_v21 = vpop.f32.mrf.mxu1 }
 0x218   :  { %v565_v24 = vadd.f32 %v889_v20, %v564_v21 }
 0x219   :  { %v1014_v25 = vpop.f32.mrf.mxu1 }
 0x21a   :  { %v591_v26 = vsel %vm575_vm1, %v565_v24, -1e+30 }
 0x21b   :  { %v567_v27 = vpop.f32.mrf.mxu1  ;;  %v668_v28 = vmul.f32 0.5, %v591_v26 }
 0x21c   :  { %v568_v29 = vadd.f32 %v889_v20, %v567_v27 }
 0x21d   :  { %690 = vmax.xlane.f32.xlu0 %v668_v28  ;;  %v1015_v30 = vpop.f32.mrf.mxu1 }
 0x21e   :  { %v592_v31 = vsel %vm575_vm1, %v568_v29, -1e+30 }
 0x21f   :  { %v669_v32 = vmul.f32 0.5, %v592_v31 }
 0x221   :  { %692 = vmax.xlane.f32.xlu1 %v669_v32 }
 0x232   :  { %619 = vperm.xlu1 %1045, %v594_v33  }
 0x233   :  { %616 = vperm.xlu0 %1044, %v593_v34  }
 0x284   :  { %v1473_v35 = vpop.xlane.xlu0 %595 }
 0x285   :  { %v599_v36 = vsub.f32 %v1450_v13, %v1473_v35 }
 0x286   :  { %v671_v37 = vpop.xlane.xlu1 %670 }
 0x287   :  { %v601_v38 = vmul.f32 1.442695, %v599_v36  ;;  %v1477_v39 = vsub.f32 %v666_v15, %v671_v37 }
 0x288   :  { %v1479_v40 = vpop.xlane.xlu0 %597 }
 0x289   :  { %1086 = vpow2.f32 %v601_v38  ;;  %v676_v41 = vmul.f32 1.442695, %v1477_v39  ;;  %v600_v42 = vsub.f32 %v1456_v18, %v1479_v40 }
 0x28a   :  { %v673_v43 = vpop.xlane.xlu1 %672 }
 0x28b   :  { %v603_v44 = vmul.f32 1.442695, %v600_v42  ;;  %v1484_v45 = vsub.f32 %v667_v19, %v673_v43  ;;  %1088 = vpow2.f32 %v676_v41 }
 0x28d   :  { %1090 = vpow2.f32 %v603_v44  ;;  %v678_v46 = vmul.f32 1.442695, %v1484_v45 }
 0x28f   :  { %1092 = vpow2.f32 %v678_v46 }
 0x296   :  { %v1087_v47 = vpop.eup %1086 }
 0x297   :  { %605 = vadd.xlane.f32.xlu1 %v1087_v47 }
 0x298   :  { %v1089_v48 = vpop.eup %1088 }
 0x29a   :  { %v1091_v49 = vpop.eup %1090 }
 0x29b   :  { %607 = vadd.xlane.f32.xlu0 %v1091_v49  ;;  %680 = vadd.xlane.f32.xlu1 %v1089_v48 }
 0x29c   :  { %v1093_v50 = vpop.eup %1092 }
 0x29f   :  { %682 = vadd.xlane.f32.xlu1 %v1093_v50 }
 0x2a6   :  { %v691_v51 = vpop.xlane.xlu0 %690 }
 0x2a7   :  { %v1487_v52 = vsub.f32 %v668_v28, %v691_v51 }
 0x2a9   :  { %v696_v53 = vmul.f32 1.442695, %v1487_v52 }
 0x2aa   :  { %v693_v54 = vpop.xlane.xlu1 %692 }
 0x2ab   :  { %1094 = vpow2.f32 %v696_v53  ;;  %v1490_v55 = vsub.f32 %v669_v32, %v693_v54 }
 0x2ad   :  { %v698_v56 = vmul.f32 1.442695, %v1490_v55 }
 0x2ae   :  { %v617_v58 = vpop.permute.xlu0 %616  ;;  %v620_v60 = vpop.permute.xlu1 %619 }
 0x2af   :  { %1096 = vpow2.f32 %v698_v56  ;;  %vm621_vm4 = vcmp.eq.s32.totalorder %v1442_v6, %v617_v58  ;;  %vm622_vm6 = vcmp.eq.s32.totalorder %v1442_v6, %v620_v60  ;;  %v748_v58 = vmul.f32 %v1409_v22, %v1409_v22 }
 0x2b0   :  { %v623_v63 = vsel %vm621_vm4, %v1450_v13, 0.0  ;;  %v624_v9 = vsel %vm622_vm6, %v1456_v18, 0.0  ;;  %v738_v13 = vadd.f32 %v735_v14, %v734_v10  ;;  %v749_v60 = vmul.f32 %v1411_v23, %v1411_v23 }
 0x2b8   :  { %v1493_v57 = vpop.eup %1094 }
 0x2b9   :  { %700 = vadd.xlane.f32.xlu1 %v1493_v57 }
 0x2bc   :  { %v1496_v59 = vpop.eup %1096 }
 0x2bd   :  { %702 = vadd.xlane.f32.xlu1 %v1496_v59 }
 0x2c1   :  { %625 = vadd.xlane.f32.xlu1 %v623_v63 }
 0x2c5   :  { %627 = vadd.xlane.f32.xlu1 %v624_v9 }
 0x2c9   :  { %657 = vadd.xlane.f32.xlu1 %v656_v0 }
 0x2cd   :  { %739 = vadd.xlane.f32.xlu1 %v738_v13 }
 0x2d1   :  { %769 = vadd.xlane.f32.xlu1 %v1439_v3 }
 0x320   :  { %v606_v15 = vpop.xlane.xlu1 %605 }
 0x321   :  { %1098 = vlog2.f32 %v606_v15 }
 0x324   :  { %v608_v11 = vpop.xlane.xlu0 %607  ;;  %v681_v16 = vpop.xlane.xlu1 %680 }
 0x325   :  { %1100 = vlog2.f32 %v608_v11 }
 0x326   :  { %1102 = vlog2.f32 %v681_v16 }
 0x328   :  { %v683_v12 = vpop.xlane.xlu1 %682 }
 0x329   :  { %1104 = vlog2.f32 %v683_v12 }
 0x32e   :  { %v1099_v17 = vpop.eup %1098 }
 0x32f   :  { %v610_v18 = vmul.f32 0.6931472, %v1099_v17 }
 0x331   :  { %v613_v3 = vadd.f32 %v610_v18, %v1473_v35 }
 0x332   :  { %v1101_v20 = vpop.eup %1100 }
 0x333   :  { %v612_v24 = vmul.f32 0.6931472, %v1101_v20  ;;  %v1103_v26 = vpop.eup %1102 }
 0x334   :  { %v685_v29 = vmul.f32 0.6931472, %v1103_v26 }
 0x335   :  { %v614_v28 = vadd.f32 %v612_v24, %v1479_v40 }
 0x336   :  { %v1105_v31 = vpop.eup %1104  ;;  %v688_v38 = vsub.f32 %v1477_v39, %v685_v29 }
 0x337   :  { %v687_v42 = vmul.f32 0.6931472, %v1105_v31 }
 0x339   :  { %v689_v50 = vsub.f32 %v1484_v45, %v687_v42 }
 0x342   :  { %v701_v19 = vpop.xlane.xlu1 %700 }
 0x343   :  { %1106 = vlog2.f32 %v701_v19 }
 0x344   :  { %1108 = vrcp.f32 %v701_v19 }
 0x346   :  { %v703_v21 = vpop.xlane.xlu1 %702 }
 0x347   :  { %1110 = vlog2.f32 %v703_v21 }
 0x348   :  { %1112 = vrcp.f32 %v703_v21 }
 0x34a   :  { %v626_v25 = vpop.xlane.xlu1 %625 }
 0x34b   :  { %v637_v27 = vsub.f32 %v613_v3, %v626_v25 }
 0x34d   :  { %v639_v32 = vmul.f32 %v898_v61, %v637_v27 }
 0x34e   :  { %v628_v30 = vpop.xlane.xlu1 %627 }
 0x34f   :  { %v638_v33 = vsub.f32 %v614_v28, %v628_v30  ;;  %v642_v35 = vsel %vm641_vm5, %v639_v32, 0.0 }
 0x350   :  { %v1107_v34 = vpop.eup %1106 }
 0x351   :  { %v705_v36 = vmul.f32 0.6931472, %v1107_v34  ;;  %v640_v37 = vmul.f32 %v899_v62, %v638_v33  ;;  %v1109_v41 = vpop.eup %1108 }
 0x352   :  { %v712_v39 = vmul.f32 %v1109_v41, %v1493_v57  ;;  %v752_v57 = vadd.f32 %v749_v60, %v748_v58 }
 0x353   :  { %v708_v43 = vsub.f32 %v1487_v52, %v705_v36  ;;  %v643_v44 = vsel %vm641_vm5, %v640_v37, 0.0 }
 0x354   :  { %v1111_v46 = vpop.eup %1110  ;;  %v644_v40 = vadd.f32 %v643_v44, %v642_v35 }
 0x355   :  { %v707_v47 = vmul.f32 0.6931472, %v1111_v46  ;;  %v714_v48 = vsub.f32 %v708_v43, %v688_v38  ;;  %v1113_v49 = vpop.eup %1112 }
 0x356   :  { %645 = vadd.xlane.f32.xlu0 %v644_v40  ;;  %v713_v53 = vmul.f32 %v1113_v49, %v1496_v59 }
 0x357   :  { %v709_v51 = vsub.f32 %v1490_v55, %v707_v47  ;;  %v716_v52 = vmul.f32 %v714_v48, %v712_v39 }
 0x359   :  { %v715_v54 = vsub.f32 %v709_v51, %v689_v50  ;;  %v718_v61 = vsel %vm575_vm1, %v716_v52, 0.0 }
 0x35b   :  { %v717_v56 = vmul.f32 %v715_v54, %v713_v53 }
 0x35d   :  { %v719_v45 = vsel %vm575_vm1, %v717_v56, 0.0 }
 0x35e   :  { %v722_v55 = vadd.f32 %v719_v45, %v718_v61 }
 0x360   :  { %723 = vadd.xlane.f32.xlu0 %v722_v55 }
 0x364   :  { %753 = vadd.xlane.f32.xlu0 %v752_v57 }
 0x368   :  { %783 = vadd.xlane.f32.xlu0 %v1437_v2 }
 0x369   :  { %1225 = shalt.err (!%p1222_p1)
}
 0x36a   :  { %840 = dma.vmem_to_hbm [thread:$0]  %s835_s21, 256, %s1566_s11, [#allocation4], %s1269_s17, %s1269_s17, %s1270_s18   ;;  %v658_v22 = vpop.xlane.xlu1 %657  ;;  %v578_v50 = vshrl.u32 %v573_v5, 7  ;;  %vm793_vm8 = vcmp.eq.s32.totalorder %v1442_v6, 0  ;;  %vm798_vm9 = vcmp.eq.s32.totalorder %v1442_v6, 1  ;;  %vm803_vm12 = vcmp.eq.s32.totalorder %v1442_v6, 2 }
 0x36b   :  { %v659_v23 = vrot.slane %v658_v22, 4  ;;  %vm808_vm13 = vcmp.eq.s32.totalorder %v1442_v6, 3  ;;  %vm813_vm15 = vcmp.eq.s32.totalorder %v1442_v6, 4  ;;  %vm818_vm1 = vcmp.eq.s32.totalorder %v1442_v6, 5  ;;  %s1277_s29 = smov [#allocation12]  }
 0x36c   :  { %vm792_vm7 = vcmp.eq.s32.totalorder %v578_v50, 0  ;;  %vm823_vm3 = vcmp.eq.s32.totalorder %v1442_v6, 6  ;;  %s847_s30 = sshll.u32 %s1277_s29, 4  ;;  %s848_s30 = int_to_ptr.vmem [resolvable:$true] %s847_s30 }
 0x36d   :  { %v660_v2 = vadd.f32 %v659_v23, %v658_v22  ;;  %vm794_vm10 = vmand %vm792_vm7, %vm793_vm8  ;;  %s1234_s5 = scalar_lea.vmem %s848_s30, 128  ;;  %p1239_p3 = scmp.lt.s32.totalorder %s848_s30, %s848_s30 }
 0x36e   :  { %v740_v59 = vpop.xlane.xlu1 %739  ;;  %vm799_vm11 = vmand %vm792_vm7, %vm798_vm9  ;;  %p1235_p2 = scmp.ne.s32.totalorder %s848_s30, %s1234_s5  ;;  %p1240_p4 = scmp.lt.s32.totalorder %s1234_s5, %s1234_s5 }
 0x36f   :  { %v661_v62 = vrot.slane %v660_v2, 2  ;;  %v741_v4 = vrot.slane %v740_v59, 4  ;;  %vm804_vm14 = vmand %vm792_vm7, %vm803_vm12 }
 0x370   :  { %vm809_vm0 = vmand %vm792_vm7, %vm808_vm13  ;;  %p1241_p5 = por %p1240_p4, %p1239_p3 }
 0x371   :  { %v662_v7 = vadd.f32 %v661_v62, %v660_v2  ;;  %v742_v10 = vadd.f32 %v741_v4, %v740_v59  ;;  %vm814_vm2 = vmand %vm792_vm7, %vm813_vm15 }
 0x372   :  { %v770_v8 = vpop.xlane.xlu1 %769  ;;  %vm819_vm4 = vmand %vm792_vm7, %vm818_vm1  ;;  %p1242_p6 = pnand %p1241_p5, %p1235_p2 }
 0x373   :  { %v771_v14 = vrot.slane %v770_v8, 4  ;;  %v663_v13 = vrot.slane %v662_v7, 1  ;;  %v743_v16 = vrot.slane %v742_v10, 2  ;;  %vm824_vm5 = vmand %vm792_vm7, %vm823_vm3 }
 0x375   :  { %v772_v12 = vadd.f32 %v771_v14, %v770_v8  ;;  %v664_v19 = vadd.f32 %v663_v13, %v662_v7  ;;  %v744_v25 = vadd.f32 %v743_v16, %v742_v10 }
 0x377   :  { %v773_v24 = vrot.slane %v772_v12, 2  ;;  %v745_v32 = vrot.slane %v744_v25, 1 }
 0x379   :  { %v774_v30 = vadd.f32 %v773_v24, %v772_v12  ;;  %v746_v42 = vadd.f32 %v745_v32, %v744_v25 }
 0x37b   :  { %v775_v43 = vrot.slane %v774_v30, 1 }
 0x37d   :  { %v776_v47 = vadd.f32 %v775_v43, %v774_v30 }
 0x3df   :  { %v646_v63 = vpop.xlane.xlu0 %645 }
 0x3e0   :  { %v647_v1 = vrot.slane %v646_v63, 4 }
 0x3e2   :  { %v648_v9 = vadd.f32 %v647_v1, %v646_v63 }
 0x3e4   :  { %v649_v0 = vrot.slane %v648_v9, 2 }
 0x3e6   :  { %v650_v15 = vadd.f32 %v649_v0, %v648_v9 }
 0x3e8   :  { %v651_v11 = vrot.slane %v650_v15, 1 }
 0x3e9   :  { %v724_v17 = vpop.xlane.xlu0 %723 }
 0x3ea   :  { %v725_v18 = vrot.slane %v724_v17, 4  ;;  %v652_v20 = vadd.f32 %v651_v11, %v650_v15 }
 0x3ec   :  { %v726_v21 = vadd.f32 %v725_v18, %v724_v17  ;;  %1016 = vpush %v652_v20 }
 0x3ed   :  { %1018 = vpush %v664_v19  ;;  %v754_v3 = vpop.xlane.xlu0 %753 }
 0x3ee   :  { %v727_v26 = vrot.slane %v726_v21, 2  ;;  %v755_v27 = vrot.slane %v754_v3, 4 }
 0x3f0   :  { %v756_v28 = vadd.f32 %v755_v27, %v754_v3  ;;  %v728_v29 = vadd.f32 %v727_v26, %v726_v21 }
 0x3f1   :  { %v784_v31 = vpop.xlane.xlu0 %783 }
 0x3f2   :  { %v757_v33 = vrot.slane %v756_v28, 2  ;;  %v785_v34 = vrot.slane %v784_v31, 4  ;;  %v729_v36 = vrot.slane %v728_v29, 1 }
 0x3f4   :  { %v786_v37 = vadd.f32 %v785_v34, %v784_v31  ;;  %v730_v38 = vadd.f32 %v729_v36, %v728_v29  ;;  %v758_v41 = vadd.f32 %v757_v33, %v756_v28 }
 0x3f6   :  { %v787_v35 = vrot.slane %v786_v37, 2  ;;  %1020 = vpush %v730_v38  ;;  %v759_v44 = vrot.slane %v758_v41, 1 }
 0x3f7   :  { %1022 = vpush %v746_v42 }
 0x3f8   :  { %v788_v46 = vadd.f32 %v787_v35, %v786_v37  ;;  %v760_v40 = vadd.f32 %v759_v44, %v758_v41 }
 0x3fa   :  { %1024 = vpush %v760_v40  ;;  %v789_v48 = vrot.slane %v788_v46, 1 }
 0x3fb   :  { %1026 = vpush %v776_v47 }
 0x3fc   :  { %v790_v49 = vadd.f32 %v789_v48, %v788_v46 }
 0x3fe   :  { %1028 = vpush %v790_v49 }
 0x41d   :  { %s1017_s11 = spop %1016 }
 0x41e   :  { %s1019_s17 = spop %1018  ;;  %v795_v51 = vstv %s1017_s11 }
 0x41f   :  { %v800_v39 = vstv %s1019_s17  ;;  %v796_v53 = vsel %vm794_vm10, %v795_v51, 0.0 }
 0x420   :  { %v801_v54 = vsel %vm799_vm11, %v800_v39, 0.0 }
 0x421   :  { %v802_v5 = vadd.f32 %v801_v54, %v796_v53 }
 0x427   :  { %s1021_s18 = spop %1020 }
 0x428   :  { %v805_v52 = vstv %s1021_s18  ;;  %s1023_s26 = spop %1022 }
 0x429   :  { %v806_v56 = vsel %vm804_vm14, %v805_v52, 0.0  ;;  %v810_v58 = vstv %s1023_s26 }
 0x42a   :  { %v807_v60 = vadd.f32 %v806_v56, %v802_v5  ;;  %v811_v61 = vsel %vm809_vm0, %v810_v58, 0.0 }
 0x42b   :  { %s1025_s27 = spop %1024 }
 0x42c   :  { %v812_v45 = vadd.f32 %v811_v61, %v807_v60  ;;  %v815_v55 = vstv %s1025_s27  ;;  %s1027_s28 = spop %1026 }
 0x42d   :  { %v816_v57 = vsel %vm814_vm2, %v815_v55, 0.0  ;;  %v820_v22 = vstv %s1027_s28 }
 0x42e   :  { %v817_v23 = vadd.f32 %v816_v57, %v812_v45  ;;  %v821_v2 = vsel %vm819_vm4, %v820_v22, 0.0 }
 0x42f   :  { %s1029_s1 = spop %1028 }
 0x430   :  { %v822_v59 = vadd.f32 %v821_v2, %v817_v23  ;;  %v825_v62 = vstv %s1029_s1 }
 0x431   :  { %v826_v63 = vsel %vm824_vm5, %v825_v62, 0.0 }
 0x432   :  { %v827_v1 = vadd.f32 %v826_v63, %v822_v59 }
 0x434   :  { %828 = vst [vmem:[#allocation12] sm:$0xff] %v827_v1 }
 0x435   :  { %1245 = shalt.err (!%p1242_p6)
}
 0x436   :  { %850 = dma.vmem_to_hbm [thread:$0]  %s848_s30, 128, %s1567_s12, [#allocation13]  }
 0x437   :  { %1260 = dma.done.wait [#allocation4], 256  }
 0x438   :  { %1261 = vsyncadd [#allocation4], 4294967040 }
 0x439   :  { %1262 = dma.done.wait [#allocation13], 128  }
 0x43a   :  { %1263 = vsyncadd [#allocation13], 4294967168 }
 0x43b   :  { %857 = vsyncpa [#allocation3], 1 }
 0x43c   :  { %858 = vsyncpa [#allocation6], 1 }
 0x43d   :  { %859 = vsyncpa [#allocation9], 1 }
 0x43e   :  { %860 = vsyncpa [#allocation4], 1 }
 0x43f   :  { %861 = vsyncpa [#allocation13], 1 }

</bundles_post_ra>
